<compile_context>
chip_gen: v7x
topology: tpu7x:2x2x1
jax: 0.10.0
libtpu: 0.0.40
codegen_flags: <defaults>
</compile_context>

<pallas_src>
import jax
import jax.numpy as jnp
from jax.experimental import pallas as pl
from jax.experimental.pallas import tpu as pltpu

IN_FEATURES = 28 * 28          # 784, forced by forward's view(-1, 28*28)
HIDDEN = 128
OUT_FEATURES = 10              # classifier head
OUT_PADDED = 128               # lane-dense output head (zero-padded columns)


def _round_up(x, m):
    return ((x + m - 1) // m) * m


def _choose_tile_b(batch):
    """Batch tile: large (amortize per-step overhead) but >= 2 grid steps when
    possible so v7x can shard the parallel batch axis across both TCs."""
    if batch <= 8:
        return 8
    half = _round_up(pl.cdiv(batch, 2), 8)
    return min(1024, half)


def mlp_logsoftmax_kernel(x_ref, w1_ref, w2_ref, o_ref):
    # x_ref:  (TILE_B, 784) f32     w1_ref: (784, 128) bf16
    # w2_ref: (128, 128)    bf16    o_ref:  (TILE_B, 128) f32
    # Cast activations to bf16 in-kernel (saves HBM vs. pre-cast round trip).
    x = x_ref[...].astype(jnp.bfloat16)

    # Linear1 + ReLU (MXU matmul, f32 accumulate), re-cast to bf16 for MXU #2.
    h = jnp.dot(x, w1_ref[...], preferred_element_type=jnp.float32)
    h = jnp.maximum(h, 0.0).astype(jnp.bfloat16)

    # Output linear: full 128-wide MXU op (columns >= 10 are zero weights).
    z = jnp.dot(h, w2_ref[...], preferred_element_type=jnp.float32)

    # Mask padded logit columns to -inf so they do not perturb the softmax.
    col = jax.lax.broadcasted_iota(jnp.int32, z.shape, dimension=1)
    z = jnp.where(col < OUT_FEATURES, z, -jnp.inf)

    # Numerically-stable log_softmax along the last axis.
    m = jnp.max(z, axis=-1, keepdims=True)
    shifted = z - m
    lse = jnp.log(jnp.sum(jnp.exp(shifted), axis=-1, keepdims=True))
    o_ref[...] = (shifted - lse).astype(o_ref.dtype)


def model_forward(x_nchw, w1_t, w2_t):
    # Flatten exactly like torch .view(-1, 28*28) (row-major; no data copy).
    x2d = x_nchw.reshape(-1, IN_FEATURES)
    batch = x2d.shape[0]

    tile_b = _choose_tile_b(batch)
    grid = (pl.cdiv(batch, tile_b),)

    # Weights stored pre-transposed (in_features, out_features), cast to bf16.
    # Only the tiny output head is padded (10 -> 128 zero columns).
    w1_bf = w1_t.astype(jnp.bfloat16)                           # (784, 128)
    w2_pad = jnp.zeros((HIDDEN, OUT_PADDED), jnp.bfloat16)
    w2_pad = w2_pad.at[:, :OUT_FEATURES].set(w2_t.astype(jnp.bfloat16))

    flops = 2 * batch * (IN_FEATURES * HIDDEN + HIDDEN * OUT_PADDED)
    bytes_accessed = (x2d.size * 4            # f32 activations read
                      + w1_bf.size * 2 + w2_pad.size * 2
                      + batch * OUT_PADDED * 4)

    out_padded = pl.pallas_call(
        mlp_logsoftmax_kernel,
        out_shape=jax.ShapeDtypeStruct((batch, OUT_PADDED), jnp.float32),
        grid=grid,
        in_specs=[
            pl.BlockSpec((tile_b, IN_FEATURES), lambda i: (i, 0)),
            pl.BlockSpec((IN_FEATURES, HIDDEN), lambda i: (0, 0)),   # resident
            pl.BlockSpec((HIDDEN, OUT_PADDED), lambda i: (0, 0)),    # resident
        ],
        out_specs=pl.BlockSpec((tile_b, OUT_PADDED), lambda i: (i, 0)),
        compiler_params=pltpu.CompilerParams(
            dimension_semantics=("parallel",)),
        cost_estimate=pl.CostEstimate(
            flops=flops,
            transcendentals=batch * (OUT_PADDED + 1),
            bytes_accessed=bytes_accessed),
    )(x2d, w1_bf, w2_pad)

    # Strip the zero/masked logit columns (batch dim is already exact).
    return out_padded[:, :OUT_FEATURES]


if __name__ == "__main__":
    key = jax.random.PRNGKey(0)
    k_x, k_w1, k_w2 = jax.random.split(key, 3)

    # Small deterministic inputs: batch=2 MNIST-shaped images, NCHW.
    batch = 2
    x = jax.random.normal(k_x, (batch, 1, 28, 28), dtype=jnp.float32)

    # Deterministic parameter init mimicking nn.Linear's U(-1/sqrt(fan_in), +).
    # Stored pre-transposed: (in_features, out_features).
    bound1 = 1.0 / (IN_FEATURES ** 0.5)
    bound2 = 1.0 / (HIDDEN ** 0.5)
    w1_t = jax.random.uniform(k_w1, (IN_FEATURES, HIDDEN),
                              minval=-bound1, maxval=bound1, dtype=jnp.float32)
    w2_t = jax.random.uniform(k_w2, (HIDDEN, OUT_FEATURES),
                              minval=-bound2, maxval=bound2, dtype=jnp.float32)

    out = model_forward(x, w1_t, w2_t)
    out = jax.block_until_ready(out)

    # Pure-JAX f32 reference (PyTorch semantics); loose tolerance for bf16 MXU.
    x2d = x.reshape(-1, IN_FEATURES)
    ref = jax.nn.log_softmax(jnp.maximum(x2d @ w1_t, 0.0) @ w2_t, axis=-1)

    # Sanity: shapes, finiteness, rows exp-sum to ~1, and close to reference.
    row_sums = jnp.sum(jnp.exp(out), axis=1)
    assert out.shape == (batch, OUT_FEATURES)
    assert bool(jnp.all(jnp.isfinite(out)))
    assert jnp.allclose(row_sums, jnp.ones_like(row_sums), atol=1e-4)
    assert jnp.allclose(out, ref, atol=1e-1), float(jnp.max(jnp.abs(out - ref)))

    print("KERNEL_OK")
</pallas_src>

<mosaic_0001>
module attributes {stable_mosaic.version = 11 : i64} {
  func.func @mlp_logsoftmax_kernel(%arg0: i32, %arg1: memref<8x784xf32, #tpu.memory_space<vmem>>, %arg2: memref<784x128xbf16, #tpu.memory_space<vmem>>, %arg3: memref<128x128xbf16, #tpu.memory_space<vmem>>, %arg4: memref<8x128xf32, #tpu.memory_space<vmem>>) attributes {dimension_semantics = [#tpu.dimension_semantics<parallel>], iteration_bounds = array<i64: 1>, scalar_prefetch = 0 : i64, scratch_operands = 0 : i64, tpu.core_type = #tpu.core_type<tc>, window_params = [{transform_indices = @transform_0, window_bounds = array<i64: 8, 784>}, {pipeline_mode = #tpu.pipeline_mode<synchronous>, transform_indices = @transform_1, window_bounds = array<i64: 784, 128>}, {pipeline_mode = #tpu.pipeline_mode<synchronous>, transform_indices = @transform_2, window_bounds = array<i64: 128, 128>}, {transform_indices = @transform_3, window_bounds = array<i64: 8, 128>}]} {
    %c0 = arith.constant 0 : index
    %c0_0 = arith.constant 0 : index
    %0 = vector.load %arg1[%c0, %c0_0] : memref<8x784xf32, #tpu.memory_space<vmem>>, vector<8x784xf32>
    %1 = arith.truncf %0 : vector<8x784xf32> to vector<8x784xbf16>
    %c0_1 = arith.constant 0 : index
    %c0_2 = arith.constant 0 : index
    %2 = vector.load %arg2[%c0_1, %c0_2] : memref<784x128xbf16, #tpu.memory_space<vmem>>, vector<784x128xbf16>
    %cst = arith.constant dense<0.000000e+00> : vector<8x128xf32>
    %3 = tpu.matmul %1, %2, %cst {dimension_numbers = #tpu.dot_dimension_numbers<[1], [0], [0], [1], [0, 0, 1, 1], [], []>} : vector<8x784xbf16>, vector<784x128xbf16>, vector<8x128xf32> -> vector<8x128xf32>
    %cst_3 = arith.constant 0.000000e+00 : f32
    %4 = vector.broadcast %cst_3 : f32 to vector<8x128xf32>
    %5 = arith.maximumf %3, %4 : vector<8x128xf32>
    %6 = arith.truncf %5 : vector<8x128xf32> to vector<8x128xbf16>
    %c0_4 = arith.constant 0 : index
    %c0_5 = arith.constant 0 : index
    %7 = vector.load %arg3[%c0_4, %c0_5] : memref<128x128xbf16, #tpu.memory_space<vmem>>, vector<128x128xbf16>
    %cst_6 = arith.constant dense<0.000000e+00> : vector<8x128xf32>
    %8 = tpu.matmul %6, %7, %cst_6 {dimension_numbers = #tpu.dot_dimension_numbers<[1], [0], [0], [1], [0, 0, 1, 1], [], []>} : vector<8x128xbf16>, vector<128x128xbf16>, vector<8x128xf32> -> vector<8x128xf32>
    %9 = tpu.iota {dimensions = array<i32: 1>} : vector<8x128xi32>
    %c10_i32 = arith.constant 10 : i32
    %10 = vector.broadcast %c10_i32 : i32 to vector<8x128xi32>
    %11 = arith.cmpi slt, %9, %10 : vector<8x128xi32>
    %cst_7 = arith.constant 0xFF800000 : f32
    %12 = vector.broadcast %cst_7 : f32 to vector<8x128xf32>
    %13 = arith.select %11, %8, %12 : vector<8x128xi1>, vector<8x128xf32>
    %cst_8 = arith.constant dense<0xFF800000> : vector<8xf32>
    %14 = vector.multi_reduction <maximumf>, %13, %cst_8 [1] : vector<8x128xf32> to vector<8xf32>
    %15 = vector.shape_cast %14 : vector<8xf32> to vector<8x1xf32>
    %16 = vector.broadcast %15 : vector<8x1xf32> to vector<8x128xf32>
    %17 = arith.subf %13, %16 : vector<8x128xf32>
    %18 = math.exp %17 : vector<8x128xf32>
    %cst_9 = arith.constant dense<0.000000e+00> : vector<8xf32>
    %19 = vector.multi_reduction <add>, %18, %cst_9 [1] : vector<8x128xf32> to vector<8xf32>
    %20 = vector.shape_cast %19 : vector<8xf32> to vector<8x1xf32>
    %21 = math.log %20 : vector<8x1xf32>
    %22 = vector.broadcast %21 : vector<8x1xf32> to vector<8x128xf32>
    %23 = arith.subf %17, %22 : vector<8x128xf32>
    %c0_10 = arith.constant 0 : index
    %c0_11 = arith.constant 0 : index
    %24 = vector.load %arg4[%c0_10, %c0_11] : memref<8x128xf32, #tpu.memory_space<vmem>>, vector<8x128xf32>
    tpu.vector_store %arg4[%c0_10, %c0_11], %23 {strides = array<i32>} : memref<8x128xf32, #tpu.memory_space<vmem>>, vector<8x128xf32>,
    return
  }
  func.func @transform_0(%arg0: i32) -> (i32, i32) {
    %c0_i32 = arith.constant 0 : i32
    %c0_i32_0 = arith.constant 0 : i32
    return %arg0, %c0_i32 : i32, i32
  }
  func.func @transform_1(%arg0: i32) -> (i32, i32) {
    %c0_i32 = arith.constant 0 : i32
    %c0_i32_0 = arith.constant 0 : i32
    %c0_i32_1 = arith.constant 0 : i32
    return %c0_i32, %c0_i32_0 : i32, i32
  }
  func.func @transform_2(%arg0: i32) -> (i32, i32) {
    %c0_i32 = arith.constant 0 : i32
    %c0_i32_0 = arith.constant 0 : i32
    %c0_i32_1 = arith.constant 0 : i32
    return %c0_i32, %c0_i32_0 : i32, i32
  }
  func.func @transform_3(%arg0: i32) -> (i32, i32) {
    %c0_i32 = arith.constant 0 : i32
    %c0_i32_0 = arith.constant 0 : i32
    return %arg0, %c0_i32 : i32, i32
  }
}

</mosaic_0001>

<bundles_post_ra>
// kernel: tpu_custom_call.1
= control target key start
LH: loop header
LB: loop body
LE: loop exit
PB: predicated region body
PF: predicated region fallthrough
CT: control target
= control target key end

     0   :  { %8 = vsyncpa [#allocation3], 0  ;;  %s1297_s0 = inlined_call_operand.hbm [shape: f32[2,784], index: 0, kind: input, shape index: {}]   ;;  %s1298_s1 = inlined_call_operand.hbm [shape: bf16[784,128], index: 1, kind: input, shape index: {}]   ;;  %s1299_s2 = inlined_call_operand.hbm [shape: bf16[128,128], index: 2, kind: input, shape index: {}]   ;;  %s1300_s3 = inlined_call_operand.hbm [shape: f32[2,128], index: 3, kind: output, shape index: {}]  }
   0x1   :  { %9 = vsyncpa [#allocation6], 0 }
   0x2   :  { %10 = vsyncpa [#allocation4], 0 }
   0x3   :  { %15 = vsyncadd [#allocation3], 672  ;;  %s1194_s12 = smov [#allocation5]   ;;  %s1100_s16 = scalar_lea.hbm %s1298_s1, 6272 }
   0x4   :  { %s28_s13 = sshll.u32 %s1194_s12, 4  ;;  %p1101_p0 = scmp.ne.s32.totalorder %s1298_s1, %s1100_s16  ;;  %s29_s13 = int_to_ptr.vmem [resolvable:$true] %s28_s13 }
   0x5   :  { %p1104_p1 = scmp.lt.u32.totalorder %s1100_s16, %s1298_s1 }
   0x7   :  { %p1106_p2 = pnand %p1104_p1, %p1101_p0 }
   0x9   :  { %1109 = shalt.err (!%p1106_p2)
}
   0xa   :  { %s1110_s21 = scalar_lea.vmem %s29_s13, 6272  ;;  %p1115_p4 = scmp.lt.s32.totalorder %s29_s13, %s29_s13 }
   0xb   :  { %p1111_p3 = scmp.ne.s32.totalorder %s29_s13, %s1110_s21  ;;  %p1116_p5 = scmp.lt.s32.totalorder %s1110_s21, %s1110_s21 }
   0xd   :  { %p1117_p6 = por %p1116_p5, %p1115_p4 }
   0xf   :  { %p1118_p7 = pnand %p1117_p6, %p1111_p3 }
  0x11   :  { %1121 = shalt.err (!%p1118_p7)
}
  0x12   :  { %s1195_s22 = smov 64   ;;  %s1196_s23 = smov 4  }
  0x13   :  { %34 = dma.hbm_to_vmem [thread:$0]  %s1298_s1, 6272, %s29_s13, [#allocation6], %s1195_s22, %s1195_s22, %s1196_s23  }
  0x14   :  { %s1197_s26 = smov [#allocation2]   ;;  %s1122_s30 = scalar_lea.hbm %s1297_s0, 224 }
  0x15   :  { %s16_s27 = sshll.u32 %s1197_s26, 4  ;;  %p1123_p8 = scmp.ne.s32.totalorder %s1297_s0, %s1122_s30  ;;  %s17_s27 = int_to_ptr.vmem [resolvable:$true] %s16_s27 }
  0x16   :  { %p1126_p9 = scmp.lt.u32.totalorder %s1122_s30, %s1297_s0 }
  0x18   :  { %p1128_p10 = pnand %p1126_p9, %p1123_p8 }
  0x1a   :  { %1131 = shalt.err (!%p1128_p10)
}
  0x1b   :  { %s1132_s8 = scalar_lea.vmem %s17_s27, 224  ;;  %s1136_s1 = scalar_lea.vmem %s17_s27, 896 }
  0x1c   :  { %p1133_p11 = scmp.ne.s32.totalorder %s17_s27, %s1132_s8  ;;  %p1137_p12 = scmp.lt.s32.totalorder %s17_s27, %s17_s27 }
  0x1d   :  { %p1138_p13 = scmp.lt.s32.totalorder %s1136_s1, %s1132_s8 }
  0x1f   :  { %p1139_p0 = por %p1138_p13, %p1137_p12 }
  0x21   :  { %p1140_p1 = pnand %p1139_p0, %p1133_p11 }
  0x23   :  { %1143 = shalt.err (!%p1140_p1)
}
  0x24   :  { %s1198_s9 = smov 224   ;;  %s1199_s10 = smov 14  }
  0x25   :  { %22 = dma.hbm_to_vmem [thread:$0]  %s1297_s0, 224, %s17_s27, [#allocation3], %s1198_s9, %s1198_s9, %s1199_s10  }
  0x26   :  { %s1200_s13 = smov [#allocation7]   ;;  %s1144_s17 = scalar_lea.hbm %s1299_s2, 1024 }
  0x27   :  { %s40_s14 = sshll.u32 %s1200_s13, 4  ;;  %p1145_p2 = scmp.ne.s32.totalorder %s1299_s2, %s1144_s17  ;;  %s41_s14 = int_to_ptr.vmem [resolvable:$true] %s40_s14 }
  0x28   :  { %p1148_p3 = scmp.lt.u32.totalorder %s1144_s17, %s1299_s2 }
  0x2a   :  { %p1150_p4 = pnand %p1148_p3, %p1145_p2 }
  0x2c   :  { %1153 = shalt.err (!%p1150_p4)
}
  0x2d   :  { %s1154_s24 = scalar_lea.vmem %s41_s14, 1024  ;;  %p1159_p6 = scmp.lt.s32.totalorder %s41_s14, %s41_s14 }
  0x2e   :  { %p1155_p5 = scmp.ne.s32.totalorder %s41_s14, %s1154_s24  ;;  %p1160_p7 = scmp.lt.s32.totalorder %s1154_s24, %s1154_s24 }
  0x30   :  { %p1161_p8 = por %p1160_p7, %p1159_p6 }
  0x32   :  { %p1162_p9 = pnand %p1161_p8, %p1155_p5 }
  0x34   :  { %1165 = shalt.err (!%p1162_p9)
}
  0x35   :  { %46 = dma.hbm_to_vmem [thread:$0]  %s1299_s2, 1024, %s41_s14, [#allocation6], %s1195_s22, %s1195_s22, %s1196_s23  }
  0x36   :  { %1188 = dma.done.wait [#allocation3], 896  }
  0x37   :  { %1189 = vsyncadd [#allocation3], 4294966400 }
  0x38   :  { %1190 = dma.done.wait [#allocation6], 7296  }
  0x39   :  { %1191 = vsyncadd [#allocation6], 4294960000  ;;  %v1027_v0 = vld [vmem:[#allocation5 + $0x40] sm:$0xff]   ;;  %v1031_v4 = vld [vmem:[#allocation5 + $0x48] sm:$0xff]   ;;  %v1201_v24 = vmov 1983009808   ;;  %v80_v26 = vlaneseq }
  0x3a   :  { %v1028_v1 = vld [vmem:[#allocation5 + $0xc0] sm:$0xff]   ;;  %911 = vmatprep.subr.bf16.mxu0 %v1027_v0  ;;  %v1032_v5 = vld [vmem:[#allocation5 + $0xc8] sm:$0xff]   ;;  %v1035_v8 = vld [vmem:[#allocation5 + $0x50] sm:$0xff]   ;;  %v78_v25 = vunpack.c.l.s4 %v1201_v24  ;;  %v1202_v42 = vmov 0.0   ;;  %vm1203_vm0 = vmmov 0   ;;  %vm550_vm1 = vcmask 130048  }
  0x3b   :  { %v1029_v2 = vld [vmem:[#allocation5] sm:$0xff]   ;;  %933 = vmatprep.subr.bf16.mxu1 %v1028_v1  ;;  %v1033_v6 = vld [vmem:[#allocation5 + $0x8] sm:$0xff]   ;;  %v1036_v9 = vld [vmem:[#allocation5 + $0xd0] sm:$0xff]   ;;  %v81_v32 = vshrl.u32 %v80_v26, 7 }
  0x3c   :  { %v1030_v3 = vld [vmem:[#allocation5 + $0x80] sm:$0xff]   ;;  %912 = vmatpush3.bf16.msra.mxu0 %v1029_v2  ;;  %v1034_v7 = vld [vmem:[#allocation5 + $0x88] sm:$0xff]   ;;  %v1037_v10 = vld [vmem:[#allocation5 + $0x10] sm:$0xff]   ;;  %v79_v31 = vunpack.c.0.s8 %v78_v25 }
  0x3d   :  { %934 = vmatpush3.bf16.msra.mxu1 %v1030_v3  ;;  %913 = vmatprep.subr.bf16.mxu0 %v1031_v4  ;;  %v1038_v11 = vld [vmem:[#allocation5 + $0x90] sm:$0xff]   ;;  %v1039_v12 = vld [vmem:[#allocation5 + $0x58] sm:$0xff]   ;;  %v1043_v16 = vld [vmem:[#allocation5 + $0x60] sm:$0xff]  }
  0x3e   :  { %935 = vmatprep.subr.bf16.mxu1 %v1032_v5  ;;  %v1040_v13 = vld [vmem:[#allocation5 + $0xd8] sm:$0xff]   ;;  %v1044_v17 = vld [vmem:[#allocation5 + $0xe0] sm:$0xff]   ;;  %v1047_v20 = vld [vmem:[#allocation5 + $0x68] sm:$0xff]   ;;  %v82_v37 = vsub.s32 %v79_v31, %v81_v32 }
  0x3f   :  { %v1041_v14 = vld [vmem:[#allocation5 + $0x18] sm:$0xff]   ;;  %v1045_v18 = vld [vmem:[#allocation5 + $0x20] sm:$0xff]   ;;  %v1048_v21 = vld [vmem:[#allocation5 + $0xe8] sm:$0xff]  }
  0x40   :  { %914 = vmatpush3.bf16.msra.mxu0 %v1033_v6  ;;  %v1042_v15 = vld [vmem:[#allocation5 + $0x98] sm:$0xff]   ;;  %v1046_v19 = vld [vmem:[#allocation5 + $0xa0] sm:$0xff]   ;;  %v1049_v22 = vld [vmem:[#allocation5 + $0x28] sm:$0xff]  }
  0x41   :  { %936 = vmatpush3.bf16.msra.mxu1 %v1034_v7  ;;  %915 = vmatprep.subr.bf16.mxu0 %v1035_v8  ;;  %v1050_v23 = vld [vmem:[#allocation5 + $0xa8] sm:$0xff]   ;;  %v1051_v27 = vld [vmem:[#allocation5 + $0x70] sm:$0xff]   ;;  %v1055_v33 = vld [vmem:[#allocation5 + $0x78] sm:$0xff]  }
  0x42   :  { %937 = vmatprep.subr.bf16.mxu1 %v1036_v9  ;;  %v1052_v28 = vld [vmem:[#allocation5 + $0xf0] sm:$0xff]   ;;  %v1056_v34 = vld [vmem:[#allocation5 + $0xf8] sm:$0xff]   ;;  %v1065_v45 = vld [vmem:[#allocation5 + $0x140] sm:$0xff]  }
  0x43   :  { %v1053_v29 = vld [vmem:[#allocation5 + $0x30] sm:$0xff]   ;;  %v1057_v35 = vld [vmem:[#allocation5 + $0x38] sm:$0xff]   ;;  %v1066_v54 = vld [vmem:[#allocation5 + $0x100] sm:$0xff]  }
  0x44   :  { %916 = vmatpush3.bf16.msra.mxu0 %v1037_v10  ;;  %v1054_v30 = vld [vmem:[#allocation5 + $0xb0] sm:$0xff]   ;;  %v1058_v36 = vld [vmem:[#allocation5 + $0xb8] sm:$0xff]   ;;  %v1067_v57 = vld [vmem:[#allocation5 + $0x148] sm:$0xff]  }
  0x45   :  { %938 = vmatpush3.bf16.msra.mxu1 %v1038_v11  ;;  %917 = vmatprep.subr.bf16.mxu0 %v1039_v12  ;;  %v1059_v38 = vld [vmem:[#allocation2] ss:$14 sps:$4 sm:$0xff]   ;;  %v1061_v39 = vld [vmem:[#allocation2 + $0x1c] ss:$14 sps:$4 sm:$0xff]   ;;  %v1063_v40 = vld [vmem:[#allocation2 + $0x4] ss:$14 sps:$4 sm:$0xff]  }
  0x46   :  { %939 = vmatprep.subr.bf16.mxu1 %v1040_v13  ;;  %v1064_v41 = vld [vmem:[#allocation2 + $0x20] ss:$14 sps:$4 sm:$0xff]   ;;  %v83_v43 = vrot.slane %v1059_v38, %v82_v37  ;;  %v97_v44 = vrot.slane %v1061_v39, %v82_v37  ;;  %v90_v46 = vrot.slane %v1063_v40, %v82_v37  ;;  %v1073_v63 = vld [vmem:[#allocation5 + $0x160] sm:$0xff]   ;;  %v1085_v5 = vld [vmem:[#allocation2 + $0x24] ss:$14 sps:$4 sm:$0xff]  }
  0x47   :  { %v104_v47 = vrot.slane %v1064_v41, %v82_v37  ;;  %v1068_v58 = vld [vmem:[#allocation5 + $0x108] sm:$0xff]   ;;  %v1069_v59 = vld [vmem:[#allocation5 + $0x150] sm:$0xff]   ;;  %v1071_v61 = vld [vmem:[#allocation5 + $0x158] sm:$0xff]   ;;  %v133_v9 = vrot.slane %v1085_v5, %v82_v37 }
  0x48   :  { %918 = vmatpush3.bf16.msra.mxu0 %v1041_v14  ;;  %v106_v48 = vcombine.high %v83_v43, %v97_v44  ;;  %v105_v49 = vcombine.low %v83_v43, %v97_v44  ;;  %v1070_v60 = vld [vmem:[#allocation5 + $0x110] sm:$0xff]   ;;  %v1072_v62 = vld [vmem:[#allocation5 + $0x118] sm:$0xff]   ;;  %v1081_v0 = vld [vmem:[#allocation5 + $0x180] sm:$0xff]  }
  0x49   :  { %940 = vmatpush3.bf16.msra.mxu1 %v1042_v15  ;;  %919 = vmatprep.subr.bf16.mxu0 %v1043_v16  ;;  %v108_v50 = vcombine.high %v90_v46, %v104_v47  ;;  %v107_v51 = vcombine.low %v90_v46, %v104_v47  ;;  %v1074_v1 = vld [vmem:[#allocation5 + $0x120] sm:$0xff]   ;;  %v1075_v4 = vld [vmem:[#allocation5 + $0x168] sm:$0xff]   ;;  %v1087_v6 = vld [vmem:[#allocation2 + $0x28] ss:$14 sps:$4 sm:$0x33]  }
  0x4a   :  { %941 = vmatprep.subr.bf16.mxu1 %v1044_v17  ;;  %v152_v52 = vpack.c.bf16 %v106_v48, %v106_v48  ;;  %v151_v53 = vpack.c.bf16 %v105_v49, %v105_v49  ;;  %v1082_v2 = vld [vmem:[#allocation2 + $0x8] ss:$14 sps:$4 sm:$0xff]   ;;  %v1084_v3 = vld [vmem:[#allocation2 + $0xc] ss:$14 sps:$4 sm:$0x33]   ;;  %v140_v10 = vrot.slane %v1087_v6, %v82_v37  ;;  %v1076_v11 = vld [vmem:[#allocation5 + $0x128] sm:$0xff]  }
  0x4b   :  { %v154_v55 = vpack.c.bf16 %v108_v50, %v108_v50  ;;  %v153_v56 = vpack.c.bf16 %v107_v51, %v107_v51  ;;  %v119_v7 = vrot.slane %v1082_v2, %v82_v37  ;;  %v126_v8 = vrot.slane %v1084_v3, %v82_v37  ;;  %v1077_v14 = vld [vmem:[#allocation5 + $0x170] sm:$0xff]   ;;  %v1090_v24 = vld [vmem:[#allocation7 + $0x10] sm:$0xff]   ;;  %v1091_v25 = vld [vmem:[#allocation7 + $0x18] sm:$0xff]  }
  0x4c   :  { %920 = vmatpush3.bf16.msra.mxu0 %v1045_v18  ;;  %586 = vmatprep.mubr.bf16.mxu0 %v152_v52  ;;  %v1078_v17 = vld [vmem:[#allocation5 + $0x130] sm:$0xff]   ;;  %v1079_v18 = vld [vmem:[#allocation5 + $0x178] sm:$0xff]  }
  0x4d   :  { %942 = vmatpush3.bf16.msra.mxu1 %v1046_v19  ;;  %921 = vmatprep.subr.bf16.mxu0 %v1047_v20  ;;  %v142_v12 = vcombine.high %v119_v7, %v133_v9  ;;  %v143_v13 = vcombine.low %v126_v8, %v140_v10  ;;  %v141_v19 = vcombine.low %v119_v7, %v133_v9  ;;  %v1080_v20 = vld [vmem:[#allocation5 + $0x138] sm:$0xff]  }
  0x4e   :  { %943 = vmatprep.subr.bf16.mxu1 %v1048_v21  ;;  %626 = vmatprep.mubr.bf16.mxu1 %v154_v55  ;;  %v821_v55 = vand.u32 127, %v80_v26 }
  0x4f   :  { %v156_v15 = vpack.c.bf16 %v142_v12, %v142_v12  ;;  %v157_v16 = vpack.c.bf16 %v143_v13, %v143_v13  ;;  %v155_v21 = vpack.c.bf16 %v141_v19, %v141_v19 }
  0x50   :  { %922 = vmatpush3.bf16.msra.mxu0 %v1049_v22  ;;  %v1088_v22 = vld [vmem:[#allocation7] sm:$0xff]   ;;  %vm822_vm2 = vcmp.lt.s32.totalorder %v821_v55, 10 }
  0x51   :  { %944 = vmatpush3.bf16.msra.mxu1 %v1050_v23  ;;  %923 = vmatprep.subr.bf16.mxu0 %v1051_v27  ;;  %v1089_v23 = vld [vmem:[#allocation7 + $0x8] sm:$0xff]   ;;  %v1092_v27 = vld [vmem:[#allocation7 + $0x20] sm:$0xff]  }
  0x52   :  { %945 = vmatprep.subr.bf16.mxu1 %v1052_v28  ;;  %v1093_v28 = vld [vmem:[#allocation7 + $0x28] sm:$0xff]  }
  0x54   :  { %924 = vmatpush3.bf16.msra.mxu0 %v1053_v29  ;;  %v1094_v29 = vld [vmem:[#allocation7 + $0x30] sm:$0xff]  }
  0x55   :  { %946 = vmatpush3.bf16.msra.mxu1 %v1054_v30  ;;  %925 = vmatprep.subr.bf16.mxu0 %v1055_v33  ;;  %v1095_v30 = vld [vmem:[#allocation7 + $0x38] sm:$0xff]  }
  0x56   :  { %947 = vmatprep.subr.bf16.mxu1 %v1056_v34 }
  0x58   :  { %926 = vmatpush3.bf16.msra.mxu0 %v1057_v35 }
  0x59   :  { %948 = vmatpush3.bf16.msra.mxu1 %v1058_v36  ;;  %955 = vmatprep.subr.bf16.mxu0 %v1065_v45 }
  0x5a   :  { %988 = vmatprep.subr.bf16.mxu1 %v1202_v42 }
  0x5b   :  { %587 = vmatmul.mubr.bf16.vlgmr.msra.gmra.mrb[0].mxu0 %v151_v53 }
  0x5c   :  { %627 = vmatmul.mubr.bf16.vlgmr.msra.gmra.mrb[0].mxu1 %v153_v56  ;;  %956 = vmatpush3.bf16.msra.mxu0 %v1066_v54 }
  0x5d   :  { %957 = vmatprep.subr.bf16.mxu0 %v1067_v57  ;;  %990 = vmatprep.mubr.msk.bf16.mxu1 %vm1203_vm0, %v1202_v42 }
  0x5e   :  { %989 = vmatpush3.bf16.msra.mxu1 %v1081_v0  ;;  %666 = vmatprep.mubr.bf16.mxu0 %v156_v15 }
  0x5f   :  { %994 = vmatprep.subr.bf16.mxu1 %v1202_v42 }
  0x60   :  { %958 = vmatpush3.bf16.msra.mxu0 %v1068_v58 }
  0x61   :  { %959 = vmatprep.subr.bf16.mxu0 %v1069_v59 }
  0x64   :  { %960 = vmatpush3.bf16.msra.mxu0 %v1070_v60  ;;  %991 = vmatmul.mubr.msk.bf16.vlgmr.msra.gmra.mrb[4].mxu1 %vm550_vm1, %v157_v16 }
  0x65   :  { %961 = vmatprep.subr.bf16.mxu0 %v1071_v61  ;;  %1010 = vmatprep.mubr.msk.bf16.mxu1 %vm1203_vm0, %v1202_v42 }
  0x66   :  { %995 = vmatpush3.bf16.msra.mxu1 %v1088_v22 }
  0x67   :  { %996 = vmatprep.subr.bf16.mxu1 %v1202_v42 }
  0x68   :  { %962 = vmatpush3.bf16.msra.mxu0 %v1072_v62 }
  0x69   :  { %963 = vmatprep.subr.bf16.mxu0 %v1073_v63 }
  0x6a   :  { %997 = vmatpush3.bf16.msra.mxu1 %v1089_v23 }
  0x6b   :  { %998 = vmatprep.subr.bf16.mxu1 %v1202_v42 }
  0x6c   :  { %964 = vmatpush3.bf16.msra.mxu0 %v1074_v1 }
  0x6d   :  { %965 = vmatprep.subr.bf16.mxu0 %v1075_v4 }
  0x6e   :  { %999 = vmatpush3.bf16.msra.mxu1 %v1090_v24 }
  0x6f   :  { %1000 = vmatprep.subr.bf16.mxu1 %v1202_v42 }
  0x70   :  { %966 = vmatpush3.bf16.msra.mxu0 %v1076_v11 }
  0x71   :  { %967 = vmatprep.subr.bf16.mxu0 %v1077_v14 }
  0x72   :  { %1001 = vmatpush3.bf16.msra.mxu1 %v1091_v25 }
  0x73   :  { %1002 = vmatprep.subr.bf16.mxu1 %v1202_v42 }
  0x74   :  { %968 = vmatpush3.bf16.msra.mxu0 %v1078_v17 }
  0x75   :  { %969 = vmatprep.subr.bf16.mxu0 %v1079_v18 }
  0x76   :  { %1003 = vmatpush3.bf16.msra.mxu1 %v1092_v27 }
  0x77   :  { %1004 = vmatprep.subr.bf16.mxu1 %v1202_v42 }
  0x78   :  { %970 = vmatpush3.bf16.msra.mxu0 %v1080_v20 }
  0x7a   :  { %1005 = vmatpush3.bf16.msra.mxu1 %v1093_v28 }
  0x7b   :  { %667 = vmatmul.mubr.bf16.vlgmr.msra.gmra.mrb[4].mxu0 %v155_v21  ;;  %1006 = vmatprep.subr.bf16.mxu1 %v1202_v42 }
  0x7e   :  { %1007 = vmatpush3.bf16.msra.mxu1 %v1094_v29 }
  0x7f   :  { %1008 = vmatprep.subr.bf16.mxu1 %v1202_v42 }
  0x82   :  { %1009 = vmatpush3.bf16.msra.mxu1 %v1095_v30 }
 0x12e   :  { %v927_v31 = vpop.f32.mrb[0].mxu0 }
 0x12f   :  { %v949_v32 = vpop.f32.mrb[0].mxu1  ;;  %v928_v33 = vpop.f32.mrb[1].mxu0 }
 0x130   :  { %v929_v34 = vadd.f32 %v928_v33, %v927_v31  ;;  %v950_v35 = vpop.f32.mrb[1].mxu1  ;;  %v930_v36 = vpop.f32.mrb[2].mxu0 }
 0x131   :  { %v951_v37 = vadd.f32 %v950_v35, %v949_v32  ;;  %v931_v38 = vpop.f32.mrb[3].mxu0  ;;  %v952_v39 = vpop.f32.mrb[2].mxu1 }
 0x132   :  { %v953_v40 = vpop.f32.mrb[3].mxu1 }
 0x133   :  { %v629_v41 = vadd.f32 %v951_v37, %v929_v34 }
 0x137   :  { %v708_v43 = vpop.f32.mrb[4].mxu1 }
 0x138   :  { %v992_v44 = vpop.f32.mrb[5].mxu1 }
 0x139   :  { %v711_v45 = vpop.f32.mrb[6].mxu1 }
 0x13a   :  { %v993_v46 = vpop.f32.mrb[7].mxu1 }
 0x14e   :  { %v971_v47 = vpop.f32.mrb[4].mxu0 }
 0x14f   :  { %v972_v48 = vpop.f32.mrb[5].mxu0 }
 0x150   :  { %v973_v42 = vadd.f32 %v972_v48, %v971_v47  ;;  %v974_v49 = vpop.f32.mrb[6].mxu0 }
 0x151   :  { %v975_v50 = vpop.f32.mrb[7].mxu0 }
 0x152   :  { %v669_v51 = vadd.f32 %v973_v42, %v629_v41 }
 0x154   :  { %v709_v52 = vadd.f32 %v708_v43, %v669_v51 }
 0x156   :  { %v714_v53 = vmax.f32 %v709_v52, 0.0 }
 0x158   :  { %v715_v54 = vpack.c.bf16 %v714_v53, %v714_v53 }
 0x15a   :  { %1011 = vmatmul.mubr.bf16.vlgmr.msra.gmra.mrb[8].mxu1 %v715_v54 }
 0x22d   :  { %v814_v56 = vpop.f32.mrb[8].mxu1 }
 0x22e   :  { %v1012_v57 = vpop.f32.mrb[9].mxu1  ;;  %v823_v58 = vsel %vm822_vm2, %v814_v56, -inf }
 0x22f   :  { %824 = vmax.xlane.f32.xlu0 %v823_v58  ;;  %v817_v59 = vpop.f32.mrb[10].mxu1 }
 0x230   :  { %v1013_v60 = vpop.f32.mrb[11].mxu1 }
 0x2bc   :  { %v825_v61 = vpop.xlane.xlu0 %824 }
 0x2bd   :  { %v826_v62 = vsub.f32 %v823_v58, %v825_v61 }
 0x2bf   :  { %v827_v63 = vmul.f32 1.442695, %v826_v62 }
 0x2c1   :  { %1096 = vpow2.f32 %v827_v63 }
 0x2cb   :  { %v1097_v0 = vpop.eup %1096 }
 0x2cc   :  { %829 = vadd.xlane.f32.xlu0 %v1097_v0 }
 0x359   :  { %v830_v1 = vpop.xlane.xlu0 %829 }
 0x35a   :  { %1098 = vlog2.f32 %v830_v1 }
 0x364   :  { %v1099_v2 = vpop.eup %1098 }
 0x365   :  { %v832_v3 = vmul.f32 0.6931472, %v1099_v2 }
 0x367   :  { %v833_v4 = vsub.f32 %v826_v62, %v832_v3 }
 0x369   :  { %834 = vst [vmem:[#allocation8] sm:$0xff] %v833_v4 }
 0x36a   :  { %839 = vsyncadd [#allocation4], 96  ;;  %s1204_s2 = smov [#allocation8]  }
 0x36b   :  { %s840_s22 = sshll.u32 %s1204_s2, 4  ;;  %s841_s22 = int_to_ptr.vmem [resolvable:$true] %s840_s22 }
 0x36c   :  { %s1166_s23 = scalar_lea.vmem %s841_s22, 32  ;;  %s1170_s26 = scalar_lea.vmem %s841_s22, 128 }
 0x36d   :  { %p1167_p10 = scmp.ne.s32.totalorder %s841_s22, %s1166_s23  ;;  %p1171_p11 = scmp.lt.s32.totalorder %s841_s22, %s841_s22 }
 0x36e   :  { %p1172_p12 = scmp.lt.s32.totalorder %s1170_s26, %s1166_s23 }
 0x370   :  { %p1173_p13 = por %p1172_p12, %p1171_p11 }
 0x372   :  { %p1174_p0 = pnand %p1173_p13, %p1167_p10 }
 0x374   :  { %1177 = shalt.err (!%p1174_p0)
}
 0x375   :  { %s1178_s29 = scalar_lea.hbm %s1300_s3, 32 }
 0x376   :  { %p1179_p1 = scmp.ne.s32.totalorder %s1300_s3, %s1178_s29  ;;  %p1182_p2 = scmp.lt.u32.totalorder %s1178_s29, %s1300_s3 }
 0x378   :  { %p1184_p3 = pnand %p1182_p2, %p1179_p1 }
 0x37a   :  { %1187 = shalt.err (!%p1184_p3)
}
 0x37b   :  { %s1205_s7 = smov 32   ;;  %s1206_s8 = smov 2  }
 0x37c   :  { %846 = dma.vmem_to_hbm [thread:$0]  %s841_s22, 32, %s1300_s3, [#allocation4], %s1205_s7, %s1205_s7, %s1206_s8  }
 0x37d   :  { %1192 = dma.done.wait [#allocation4], 128  }
 0x37e   :  { %1193 = vsyncadd [#allocation4], 4294967168 }
 0x37f   :  { %850 = vsyncpa [#allocation3], 1 }
 0x380   :  { %851 = vsyncpa [#allocation6], 1 }
 0x381   :  { %852 = vsyncpa [#allocation4], 1 }

</bundles_post_ra>
